<compile_context>
chip_gen: v7x
topology: tpu7x:2x2x1
jax: 0.10.0
libtpu: 0.0.40
codegen_flags: <defaults>
</compile_context>

<pallas_src>
import functools

import jax
import jax.numpy as jnp
from jax import lax
from jax.experimental import pallas as pl
from jax.experimental.pallas import tpu as pltpu

_MiB = 1024 * 1024


def _bilinear_matrix(out_size: int, in_size: int):
    """Interpolation matrix matching torch F.interpolate(mode='bilinear',
    align_corners=False, antialias=False). Always float32 (PyTorch computes
    the interpolation weights in float32 even for reduced-precision inputs)."""
    scale = in_size / out_size
    o = jnp.arange(out_size, dtype=jnp.float32)
    src = (o + 0.5) * scale - 0.5
    src = jnp.maximum(src, 0.0)                       # PyTorch clamps negatives
    i0 = jnp.minimum(jnp.floor(src).astype(jnp.int32), in_size - 1)
    i1 = jnp.minimum(i0 + 1, in_size - 1)
    w1 = src - i0.astype(jnp.float32)
    w0 = 1.0 - w1
    mat = jnp.zeros((out_size, in_size), jnp.float32)
    rows = jnp.arange(out_size)
    mat = mat.at[rows, i0].add(w0)
    mat = mat.at[rows, i1].add(w1)
    return mat


# ----------------------------- kernels ------------------------------------- #

def _upsample_tile(x_ref, wh_ref, wwt_ref, out_ref):
    # x_ref:   (Ct, Hin, Win)   (batch dim squeezed by BlockSpec)
    # wh_ref:  (Hout, Hin)      f32
    # wwt_ref: (Win, Wout)      f32
    # out_ref: (Ct, Hout, Wout)
    ct, hin, win = x_ref.shape
    wout = wwt_ref.shape[1]
    # Compute in f32 regardless of input dtype (matches PyTorch opmath).
    x = x_ref[...].astype(jnp.float32)
    # W-contraction: ONE lane-dense 2-D matmul, M = Ct*Hin, K = Win, N = Wout.
    # The (Ct,Hin)->Ct*Hin collapse is free when Hin % 8 == 0.
    # TODO(synk): pad Hin inside the block when Hin % 8 != 0 to keep the
    # collapse relayout-free.
    tmp = jnp.dot(x.reshape(ct * hin, win), wwt_ref[...],
                  preferred_element_type=jnp.float32)        # (Ct*Hin, Wout)
    tmp3 = tmp.reshape(ct, hin, wout)                        # (Ct, Hin, Wout)
    # H-contraction, explicit dot_general (same HLO einsum would emit, but
    # layout is under our control): result (Hout, Ct, Wout), N stays
    # lane-dense, then one major-dim transpose back to (Ct, Hout, Wout).
    res = lax.dot_general(wh_ref[...], tmp3,
                          dimension_numbers=(((1,), (1,)), ((), ())),
                          preferred_element_type=jnp.float32)
    out_ref[...] = jnp.transpose(res, (1, 0, 2)).astype(out_ref.dtype)
    # TODO(synk): for exact 2x scales, a 2-tap VPU formulation (roll + two
    # weighted adds) would stay at the HBM roofline and drop wh/wwt entirely.


def _up_concat_kernel(x_ref, wh_ref, wwt_ref, skip_ref, out_ref, *, nx_tiles):
    t = pl.program_id(1)

    @pl.when(t < nx_tiles)
    def _compute():
        _upsample_tile(x_ref, wh_ref, wwt_ref, out_ref)

    @pl.when(t >= nx_tiles)
    def _copy_skip():
        # Pure pipelined copy of one (possibly edge-padded) skip channel tile.
        # TODO(synk): flatten H*W for this path when Wout % 128 != 0 so the
        # stores are unmasked / lane-dense.
        out_ref[...] = skip_ref[...].astype(out_ref.dtype)


def _up_kernel(x_ref, wh_ref, wwt_ref, out_ref):
    _upsample_tile(x_ref, wh_ref, wwt_ref, out_ref)


# ----------------------------- wrapper ------------------------------------- #

def _vmem_capacity_bytes():
    try:
        return int(pltpu.get_tpu_info().vmem_capacity_bytes)
    except Exception:
        return 64 * _MiB          # v7x-safe fallback


def transition_up(x, skip, concat=True, *, vmem_budget_bytes=None):
    """x: (B, Cx, Hin, Win), skip: (B, Cs, Hout, Wout). Returns NCHW output."""
    B, Cx, Hin, Win = x.shape
    Bs, Cs, Hout, Wout = skip.shape
    assert B == Bs, "batch mismatch between x and skip"
    if skip.dtype != x.dtype:
        skip = skip.astype(x.dtype)   # output dtype follows x (like torch.cat)

    # Interp matrices in f32 (correctness: weights must not be rounded to bf16).
    wh = _bilinear_matrix(Hout, Hin)            # (Hout, Hin)
    wwt = _bilinear_matrix(Wout, Win).T         # (Win, Wout)

    # --- per-generation VMEM budget --------------------------------------- #
    vmem_cap = _vmem_capacity_bytes()
    if vmem_budget_bytes is None:
        # ~70% of physical: ~90 MiB on v5e/v6e (128 MiB), ~45 MiB on v7x (64 MiB).
        vmem_budget_bytes = int(0.70 * vmem_cap)
    vmem_limit_bytes = min(vmem_cap,
                           max(int(0.90 * vmem_cap), vmem_budget_bytes + 8 * _MiB))

    bpe = jnp.dtype(x.dtype).itemsize

    def _tile_bytes(ct):
        # Double-buffered pipeline blocks (input dtype).
        x_blk = ct * Hin * Win * bpe
        out_blk = ct * Hout * Wout * bpe
        skip_blk = out_blk if concat else 0
        dma = 2 * (x_blk + out_blk + skip_blk)
        # Interp matrices (f32), double-buffered by the default pipeline.
        w_bytes = 2 * 4 * (Hout * Hin + Win * Wout)
        # f32 compute temporaries: upcast x, tmp, result (+ transposed copy).
        tmp = 4 * ct * (Hin * Win + Hin * Wout + 2 * Hout * Wout)
        return dma + w_bytes + tmp

    # Channel tile: largest divisor of Cx (only!) fitting the budget.  Skip
    # channels are handled by ceil(Cs / ct) extra grid steps with edge-block
    # padding, so Cs never constrains the tile size.
    need_two_steps = (not concat) and (B == 1) and (Cx > 1)
    ct = 1
    for d in range(1, Cx + 1):
        if Cx % d:
            continue
        if need_two_steps and d == Cx:
            continue                    # keep >= 2 grid steps for v7x's 2 TCs
        if _tile_bytes(d) <= vmem_budget_bytes:
            ct = d
    # TODO(synk): add a Wout grid axis for feature maps so large that even a
    # single-channel tile exceeds the VMEM budget.

    nx = Cx // ct

    out_channels = Cx + Cs if concat else Cx
    flops = int(2 * B * Cx * Hin * Wout * (Win + Hout))
    bytes_accessed = int(x.size * bpe
                         + (skip.size * bpe if concat else 0)
                         + B * out_channels * Hout * Wout * bpe
                         + 4 * (wh.size + wwt.size))
    cost = pl.CostEstimate(flops=flops, transcendentals=0,
                           bytes_accessed=bytes_accessed)
    cparams = pltpu.CompilerParams(
        dimension_semantics=("parallel", "parallel"),
        vmem_limit_bytes=vmem_limit_bytes)

    if concat:
        ns = -(-Cs // ct)                       # ceil(Cs / ct)
        grid = (B, nx + ns)
        out_shape = jax.ShapeDtypeStruct((B, Cx + Cs, Hout, Wout), x.dtype)
        kernel = functools.partial(_up_concat_kernel, nx_tiles=nx)
        grid_spec = pltpu.PrefetchScalarGridSpec(
            num_scalar_prefetch=0,
            grid=grid,
            in_specs=[
                # Clamp so skip-copy steps keep the last x block index
                # unchanged (no redundant DMA on sequential iteration).
                pl.BlockSpec((None, ct, Hin, Win),
                             lambda b, t: (b, jnp.minimum(t, nx - 1), 0, 0)),
                pl.BlockSpec((Hout, Hin), lambda b, t: (0, 0)),
                pl.BlockSpec((Win, Wout), lambda b, t: (0, 0)),
                # Clamp so compute steps keep re-using skip block 0.
                pl.BlockSpec((None, ct, Hout, Wout),
                             lambda b, t: (b, jnp.maximum(t - nx, 0), 0, 0)),
            ],
            out_specs=pl.BlockSpec((None, ct, Hout, Wout),
                                   lambda b, t: (b, t, 0, 0)),
        )
        return pl.pallas_call(
            kernel,
            out_shape=out_shape,
            grid_spec=grid_spec,
            compiler_params=cparams,
            cost_estimate=cost,
        )(x, wh, wwt, skip)
    else:
        out_shape = jax.ShapeDtypeStruct((B, Cx, Hout, Wout), x.dtype)
        grid_spec = pltpu.PrefetchScalarGridSpec(
            num_scalar_prefetch=0,
            grid=(B, nx),
            in_specs=[
                pl.BlockSpec((None, ct, Hin, Win), lambda b, t: (b, t, 0, 0)),
                pl.BlockSpec((Hout, Hin), lambda b, t: (0, 0)),
                pl.BlockSpec((Win, Wout), lambda b, t: (0, 0)),
            ],
            out_specs=pl.BlockSpec((None, ct, Hout, Wout),
                                   lambda b, t: (b, t, 0, 0)),
        )
        return pl.pallas_call(
            _up_kernel,
            out_shape=out_shape,
            grid_spec=grid_spec,
            compiler_params=cparams,
            cost_estimate=cost,
        )(x, wh, wwt)


# --------------------------- reference (glue) ------------------------------ #

def _reference(x, skip, concat=True):
    _, _, Hout, Wout = skip.shape
    wh = _bilinear_matrix(Hout, x.shape[2])
    ww = _bilinear_matrix(Wout, x.shape[3])
    up = jnp.einsum('oh,bchw,pw->bcop', wh, x.astype(jnp.float32), ww)
    up = up.astype(x.dtype)
    if concat:
        up = jnp.concatenate([up, skip.astype(x.dtype)], axis=1)
    return up


if __name__ == "__main__":
    key = jax.random.PRNGKey(0)
    kx, ks = jax.random.split(key)

    # TransitionUp stores no parameters; forward only resizes + concats.
    # gcd(Cx, Cs) == 1 on purpose: exercises the decoupled channel tiling and
    # the padded final skip block.
    B, Cx, Hin, Win = 2, 12, 8, 8
    Cs, Hout, Wout = 5, 16, 16

    x = jax.random.normal(kx, (B, Cx, Hin, Win), dtype=jnp.float32)
    skip = jax.random.normal(ks, (B, Cs, Hout, Wout), dtype=jnp.float32)

    out = transition_up(x, skip, concat=True)
    jax.block_until_ready(out)
    assert out.shape == (B, Cx + Cs, Hout, Wout), out.shape
    ref = _reference(x, skip, concat=True)
    assert jnp.allclose(out, ref, atol=1e-5, rtol=1e-5), \
        float(jnp.max(jnp.abs(out - ref)))

    out_nc = transition_up(x, skip, concat=False)
    jax.block_until_ready(out_nc)
    assert out_nc.shape == (B, Cx, Hout, Wout), out_nc.shape
    assert jnp.allclose(out_nc, _reference(x, skip, concat=False),
                        atol=1e-5, rtol=1e-5)

    print("KERNEL_OK")
</pallas_src>

<mosaic_0001>
module attributes {stable_mosaic.version = 11 : i64} {
  func.func @_up_concat_kernel(%arg0: i32, %arg1: i32, %arg2: memref<1x12x8x8xf32, #tpu.memory_space<vmem>>, %arg3: memref<16x8xf32, #tpu.memory_space<vmem>>, %arg4: memref<8x16xf32, #tpu.memory_space<vmem>>, %arg5: memref<1x12x16x16xf32, #tpu.memory_space<vmem>>, %arg6: memref<1x12x16x16xf32, #tpu.memory_space<vmem>>) attributes {dimension_semantics = [#tpu.dimension_semantics<parallel>, #tpu.dimension_semantics<parallel>], iteration_bounds = array<i64: 2, 2>, scalar_prefetch = 0 : i64, scratch_operands = 0 : i64, tpu.core_type = #tpu.core_type<tc>, window_params = [{transform_indices = @transform_0, window_bounds = array<i64: 1, 12, 8, 8>}, {pipeline_mode = #tpu.pipeline_mode<synchronous>, transform_indices = @transform_1, window_bounds = array<i64: 16, 8>}, {pipeline_mode = #tpu.pipeline_mode<synchronous>, transform_indices = @transform_2, window_bounds = array<i64: 8, 16>}, {transform_indices = @transform_3, window_bounds = array<i64: 1, 12, 16, 16>}, {transform_indices = @transform_4, window_bounds = array<i64: 1, 12, 16, 16>}]} {
    %c1_i32 = arith.constant 1 : i32
    %0 = arith.cmpi slt, %arg1, %c1_i32 : i32
    %1 = arith.extui %0 : i1 to i32
    %c0_i32 = arith.constant 0 : i32
    %2 = arith.cmpi ne, %1, %c0_i32 : i32
    scf.if %2 {
      %c0 = arith.constant 0 : index
      %c0_2 = arith.constant 0 : index
      %c0_3 = arith.constant 0 : index
      %c0_4 = arith.constant 0 : index
      %6 = vector.load %arg2[%c0, %c0_2, %c0_3, %c0_4] : memref<1x12x8x8xf32, #tpu.memory_space<vmem>>, vector<1x12x8x8xf32>
      %7 = vector.shape_cast %6 : vector<1x12x8x8xf32> to vector<12x8x8xf32>
      %8 = vector.shape_cast %7 : vector<12x8x8xf32> to vector<96x8xf32>
      %c0_5 = arith.constant 0 : index
      %c0_6 = arith.constant 0 : index
      %9 = vector.load %arg4[%c0_5, %c0_6] : memref<8x16xf32, #tpu.memory_space<vmem>>, vector<8x16xf32>
      %cst = arith.constant dense<0.000000e+00> : vector<96x16xf32>
      %10 = tpu.matmul %8, %9, %cst {dimension_numbers = #tpu.dot_dimension_numbers<[1], [0], [0], [1], [0, 0, 1, 1], [], []>} : vector<96x8xf32>, vector<8x16xf32>, vector<96x16xf32> -> vector<96x16xf32>
      %11 = vector.shape_cast %10 : vector<96x16xf32> to vector<12x8x16xf32>
      %c0_7 = arith.constant 0 : index
      %c0_8 = arith.constant 0 : index
      %12 = vector.load %arg3[%c0_7, %c0_8] : memref<16x8xf32, #tpu.memory_space<vmem>>, vector<16x8xf32>
      %cst_9 = arith.constant dense<0.000000e+00> : vector<16x12x16xf32>
      %13 = tpu.matmul %12, %11, %cst_9 {dimension_numbers = #tpu.dot_dimension_numbers<[1], [1], [0], [0, 2], [0, 0, 1, 0, 1, 2], [], []>} : vector<16x8xf32>, vector<12x8x16xf32>, vector<16x12x16xf32> -> vector<16x12x16xf32>
      %14 = tpu.transpose %13, [1, 0, 2] : vector<16x12x16xf32> -> vector<12x16x16xf32>
      %c0_10 = arith.constant 0 : index
      %c0_11 = arith.constant 0 : index
      %c0_12 = arith.constant 0 : index
      %c0_13 = arith.constant 0 : index
      %15 = vector.load %arg6[%c0_10, %c0_11, %c0_12, %c0_13] : memref<1x12x16x16xf32, #tpu.memory_space<vmem>>, vector<1x12x16x16xf32>
      %16 = vector.shape_cast %15 : vector<1x12x16x16xf32> to vector<12x16x16xf32>
      %17 = vector.shape_cast %14 : vector<12x16x16xf32> to vector<1x12x16x16xf32>
      tpu.vector_store %arg6[%c0_10, %c0_11, %c0_12, %c0_13], %17 {strides = array<i32>} : memref<1x12x16x16xf32, #tpu.memory_space<vmem>>, vector<1x12x16x16xf32>,
    } else {
    }
    %c1_i32_0 = arith.constant 1 : i32
    %3 = arith.cmpi sge, %arg1, %c1_i32_0 : i32
    %4 = arith.extui %3 : i1 to i32
    %c0_i32_1 = arith.constant 0 : i32
    %5 = arith.cmpi ne, %4, %c0_i32_1 : i32
    scf.if %5 {
      %c0 = arith.constant 0 : index
      %c0_2 = arith.constant 0 : index
      %c0_3 = arith.constant 0 : index
      %c0_4 = arith.constant 0 : index
      %6 = vector.load %arg5[%c0, %c0_2, %c0_3, %c0_4] : memref<1x12x16x16xf32, #tpu.memory_space<vmem>>, vector<1x12x16x16xf32>
      %7 = vector.shape_cast %6 : vector<1x12x16x16xf32> to vector<12x16x16xf32>
      %c0_5 = arith.constant 0 : index
      %c0_6 = arith.constant 0 : index
      %c0_7 = arith.constant 0 : index
      %c0_8 = arith.constant 0 : index
      %8 = vector.load %arg6[%c0_5, %c0_6, %c0_7, %c0_8] : memref<1x12x16x16xf32, #tpu.memory_space<vmem>>, vector<1x12x16x16xf32>
      %9 = vector.shape_cast %8 : vector<1x12x16x16xf32> to vector<12x16x16xf32>
      %10 = vector.shape_cast %7 : vector<12x16x16xf32> to vector<1x12x16x16xf32>
      tpu.vector_store %arg6[%c0_5, %c0_6, %c0_7, %c0_8], %10 {strides = array<i32>} : memref<1x12x16x16xf32, #tpu.memory_space<vmem>>, vector<1x12x16x16xf32>,
    } else {
    }
    return
  }
  func.func @transform_0(%arg0: i32, %arg1: i32) -> (i32, i32, i32, i32) {
    %c0_i32 = arith.constant 0 : i32
    %0 = arith.minsi %arg1, %c0_i32 : i32
    %c0_i32_0 = arith.constant 0 : i32
    %c0_i32_1 = arith.constant 0 : i32
    %c0_i32_2 = arith.constant 0 : i32
    return %arg0, %0, %c0_i32_0, %c0_i32_1 : i32, i32, i32, i32
  }
  func.func @transform_1(%arg0: i32, %arg1: i32) -> (i32, i32) {
    %c0_i32 = arith.constant 0 : i32
    %c0_i32_0 = arith.constant 0 : i32
    %c0_i32_1 = arith.constant 0 : i32
    return %c0_i32, %c0_i32_0 : i32, i32
  }
  func.func @transform_2(%arg0: i32, %arg1: i32) -> (i32, i32) {
    %c0_i32 = arith.constant 0 : i32
    %c0_i32_0 = arith.constant 0 : i32
    %c0_i32_1 = arith.constant 0 : i32
    return %c0_i32, %c0_i32_0 : i32, i32
  }
  func.func @transform_3(%arg0: i32, %arg1: i32) -> (i32, i32, i32, i32) {
    %c1_i32 = arith.constant 1 : i32
    %0 = arith.subi %arg1, %c1_i32 : i32
    %c0_i32 = arith.constant 0 : i32
    %1 = arith.maxsi %0, %c0_i32 : i32
    %c0_i32_0 = arith.constant 0 : i32
    %c0_i32_1 = arith.constant 0 : i32
    %c0_i32_2 = arith.constant 0 : i32
    return %arg0, %1, %c0_i32_0, %c0_i32_1 : i32, i32, i32, i32
  }
  func.func @transform_4(%arg0: i32, %arg1: i32) -> (i32, i32, i32, i32) {
    %c0_i32 = arith.constant 0 : i32
    %c0_i32_0 = arith.constant 0 : i32
    %c0_i32_1 = arith.constant 0 : i32
    return %arg0, %arg1, %c0_i32, %c0_i32_0 : i32, i32, i32, i32
  }
}

</mosaic_0001>

<bundles_post_ra>
// kernel: tpu_custom_call.1
= control target key start
LH: loop header
LB: loop body
LE: loop exit
PB: predicated region body
PF: predicated region fallthrough
CT: control target
= control target key end

     0   :  { %s2821_s15 = smov 0   ;;  %s2823_s16 = smov 0   ;;  %s3453_s0 = inlined_call_operand.vmem [shape: f32[2,12,8,8], index: 0, kind: input, shape index: {}]   ;;  %s3454_s1 = inlined_call_operand.vmem [shape: f32[16,8], index: 1, kind: input, shape index: {}]   ;;  %s3455_s2 = inlined_call_operand.vmem [shape: f32[8,16], index: 2, kind: input, shape index: {}]   ;;  %s3456_s3 = inlined_call_operand.vmem [shape: f32[2,5,16,16], index: 3, kind: input, shape index: {}]   ;;  %s3457_s4 = inlined_call_operand.vmem [shape: f32[2,17,16,16], index: 4, kind: output, shape index: {}]  }
   0x1   :  { %s2825_s17 = smov 0   ;;  %s2827_s18 = smov 0  }
   0x2   :  { %s2829_s19 = smov 0   ;;  %s2831_s20 = smov 0  }
   0x3   :  { %s2833_s21 = smov 0  }
   0x4 LB: > { %3461 = sst [smem:[#allocation3_spill]] %s2748_s20  ;;  %s23_s22 = sadd.s32 1, %s2744_s19  ;;  %s2752_s21 = sphi %s2833_s21, %s14_s21   ;;  %s2748_s20 = sphi %s2831_s20, %s3471_s20   ;;  %s2744_s19 = sphi %s2829_s19, %s3475_s19   ;;  %s2740_s18 = sphi %s2827_s18, %s3469_s18   ;;  %s2736_s17 = sphi %s2825_s17, %s3474_s17   ;;  %s2732_s16 = sphi %s2823_s16, %s3473_s16   ;;  %s2728_s15 = sphi %s2821_s15, %s3472_s15  }
   0x5   : > { %p24_p0 = scmp.ge.s32.totalorder %s23_s22, 2  ;;  %s26_s23 = sadd.s32 1, %s2748_s20 }
   0x6   : > { %s2418_s24 = sadd.s32 4294967295, %s2752_s21   ;;  %p153_p1 = scmp.ne.s32.totalorder %s2732_s16, %s2728_s15 }
   0x7   : > { %s3477_s22 = smov (%p24_p0, %s23_s22), 0  ;;  %s3479_s23 = smov (!%p24_p0, %s26_s23), %s2748_s20 }
   0x8   : > { %3462 = sst [smem:[#allocation4_spill]] %s3477_s22  ;;  %s139_s25 = ssub.s32 %s2744_s19, %s3477_s22 }
   0x9   : > { %p154_p2 = scmp.eq.s32.totalorder %s2418_s24, 3  ;;  %p28_p3 = scmp.ge.s32.totalorder %s3479_s23, 2 }
   0xa   : > { %p2424_p4 = scmp.ge.s32.totalorder %s2752_s21, 1  ;;  %p227_p6 = scmp.lt.s32.totalorder %s2752_s21, 5 }
   0xb   : > { %p2867_p5 = por %p154_p2, %p153_p1  ;;  %s3481_s23 = smov (%p28_p3, %s3479_s23), 0 }
   0xc   : > { %3464 = sst [smem:[#allocation5_spill]] %s3481_s23  ;;  %p228_p7 = pnand %p2424_p4, %p227_p6 }
   0xd   : > { %s138_s27 = ssub.s32 %s2748_s20, %s3481_s23  ;;  %s143_s29 = sadd.s32 1, %s2732_s16 }
   0xe   : > { %s140_s28 = sor.u32 %s139_s25, %s138_s27  ;;  %231 = sbr.rel (%p228_p7) target bundleno = 892 (0x37c), region = 36 }
   0xf   : > { %p141_p8 = scmp.eq.s32.totalorder %s140_s28, 0  ;;  %s271_s5 = sand.u32 (!%p228_p7), 1, %s2728_s15  }
  0x10   : > { %p274_p9 = scmp.lt.s32.totalorder (!%p228_p7), %s2736_s17, 0  ;;  %s2527_s6 = smul.u32 (!%p228_p7), 192, %s271_s5 }
  0x11   : > { %s2878_s30 = scalar_select %p141_p8, %s2732_s16, %s143_s29  }
  0x12   : > { %p277_p10 = scmp.lt.s32.totalorder (!%p228_p7), %s2740_s18, 1  ;;  %s2426_s8 = sadd.s32 (!%p228_p7), 4294967295, %s2736_s17 }
  0x13   : > { %p289_p11 = scmp.gt.s32.totalorder (!%p228_p7), %s2426_s8, 0  ;;  %s2896_s20 = scalar_lea.vmem (!%p228_p7), [#allocation2], %s2527_s6  }
  0x14   : > { %p2429_p0 = scmp.ge.s32.totalorder (!%p228_p7), %s2736_s17, 1 }
  0x15   : > { %s275_s7 = scalar_select %p274_p9, %s2736_s17, 0 }
  0x16   : > { %s278_s10 = scalar_select %p277_p10, %s2740_s18, 1 }
  0x17   : > { %s276_s9 = smul.u32 12, %s275_s7  ;;  %s3485_s8 = smov (!%p289_p11, %s2426_s8), 0  ;;  %v333_v0 = vld [vmem:[%s3455_s2] sm:$0xff] (!%p2429_p0)  ;;  %vm334_vm0 = vcmask (!%p2429_p0), 64512   ;;  %v2786_v13 = vmov (!%p2429_p0), 1983009808   ;;  %v503_v15 = vlaneseq (!%p2429_p0) }
  0x18   : > { %s2528_s11 = smul.u32 12, %s278_s10  ;;  %2505 = vmatprep.subr.mxu0 (!%p2429_p0), %v333_v0  ;;  %2525 = vmatprep.subr.mxu1 (!%p2429_p0), %v333_v0  ;;  %v501_v14 = vunpack.c.l.s4 (!%p2429_p0), %v2786_v13  ;;  %v2787_v16 = vmov (!%p2429_p0), 1934713408   ;;  %s2788_s23 = smov (!%p2429_p0), 48   ;;  %vm946_vm1 = vcmask (!%p2429_p0), 130048   ;;  %vm948_vm2 = vcmask (!%p2429_p0), 261120  }
  0x19   : > { %p279_p12 = scmp.lt.s32.totalorder %s276_s9, 11  ;;  %s291_s14 = smul.u32 12, %s3485_s8  ;;  %2506 = vmatpush3.msra.mxu0 (!%p2429_p0), %v333_v0  ;;  %2526 = vmatpush3.msra.mxu1 (!%p2429_p0), %v333_v0  ;;  %v565_v17 = vunpack.c.l.s4 (!%p2429_p0), %v2787_v16  ;;  %v504_v19 = vshrl.u32 (!%p2429_p0), %v503_v15, 7  ;;  %vm950_vm3 = vcmask (!%p2429_p0), 392192   ;;  %vm952_vm4 = vcmask (!%p2429_p0), 523264  }
  0x1a   : > { %s2529_s15 = smul.u32 10, %s278_s10  ;;  %v502_v18 = vunpack.c.0.s8 (!%p2429_p0), %v501_v14  ;;  %s2789_s6 = smov (!%p2429_p0), 16   ;;  %vm954_vm5 = vcmask (!%p2429_p0), 654336   ;;  %vm956_vm6 = vcmask (!%p2429_p0), 785408   ;;  %vm958_vm7 = vcmask (!%p2429_p0), 916480  }
  0x1b   : > { %s3483_s9 = smov (!%p279_p12, %s276_s9), 11  ;;  %p297_p13 = scmp.lt.s32.totalorder %s291_s14, 4  ;;  %v566_v22 = vunpack.c.0.s8 (!%p2429_p0), %v565_v17 }
  0x1c   : > { %s282_s12 = sadd.s32 %s2528_s11, %s3483_s9  ;;  %320 = sbr.rel (%p2429_p0) target bundleno = 807 (0x327), region = 40  ;;  %v2926_v24 = vsub.s32 (!%p2429_p0), %v502_v18, %v504_v19 }
  0x1d   : > { %s2425_s13 = sshll.u32 %s282_s12, 3  ;;  %s3487_s14 = smov (!%p297_p13, %s291_s14), 4  ;;  %v2928_v32 = vsub.s32 (!%p2429_p0), %v566_v22, %v504_v19 }
  0x1e   : > { %s2889_s27 = scalar_lea.vmem %s3453_s0, %s2425_s13  ;;  %s2427_s28 = sshll.u32 %s3487_s14, 1 }
  0x1f   : > { %s301_s29 = sadd.s32 %s2529_s15, %s2427_s28  ;;  %v321_v1 = vld [vmem:[%s2889_s27] sm:$0xff] (!%p2429_p0)  ;;  %v322_v2 = vld [vmem:[%s2889_s27 + $0x8] sm:$0xff] (!%p2429_p0)  ;;  %v323_v3 = vld [vmem:[%s2889_s27 + $0x10] sm:$0xff] (!%p2429_p0)  ;;  %s2790_s10 = smov (!%p2429_p0), 32  }
  0x20   : > { %s2428_s5 = sshll.u32 %s301_s29, 3  ;;  %2507 = vmatprep.mubr.msk.f32.mxu0 (!%p2429_p0), %vm334_vm0, %v321_v1  ;;  %v329_v4 = vld [vmem:[%s2889_s27 + $0x40] sm:$0xff] (!%p2429_p0)  ;;  %v330_v5 = vld [vmem:[%s2889_s27 + $0x48] sm:$0xff] (!%p2429_p0)  ;;  %v331_v6 = vld [vmem:[%s2889_s27 + $0x50] sm:$0xff] (!%p2429_p0)  ;;  %s2791_s11 = smov (!%p2429_p0), 64  }
  0x21   : > { %s2894_s22 = scalar_lea.vmem %s3456_s3, %s2428_s5  ;;  %2508 = vmatmul.mubr.msk.f32.vlgmr.msra.gmra.mrb[0].mxu0 (!%p2429_p0), %vm334_vm0, %v322_v2  ;;  %v324_v7 = vld [vmem:[%s2889_s27 + $0x18] sm:$0xff] (!%p2429_p0)  ;;  %2519 = vmatprep.mubr.msk.f32.mxu1 (!%p2429_p0), %vm334_vm0, %v329_v4  ;;  %v325_v8 = vld [vmem:[%s2889_s27 + $0x20] sm:$0xff] (!%p2429_p0)  ;;  %v326_v10 = vld [vmem:[%s2889_s27 + $0x28] sm:$0xff] (!%p2429_p0)  ;;  %s2793_s12 = smov (!%p2429_p0), 80  }
  0x22   : > { %2510 = vmatprep.mubr.msk.f32.mxu0 (!%p2429_p0), %vm334_vm0, %v323_v3  ;;  %2520 = vmatmul.mubr.msk.f32.vlgmr.msra.gmra.mrb[0].mxu1 (!%p2429_p0), %vm334_vm0, %v330_v5  ;;  %v332_v9 = vld [vmem:[%s2889_s27 + $0x58] sm:$0xff] (!%p2429_p0)  ;;  %v327_v11 = vld [vmem:[%s2889_s27 + $0x30] sm:$0xff] (!%p2429_p0)  ;;  %s2794_s13 = smov (!%p2429_p0), 96   ;;  %s2795_s14 = smov (!%p2429_p0), 112  }
  0x23   : > { %2522 = vmatprep.mubr.msk.f32.mxu1 %vm334_vm0, %v331_v6  ;;  %v328_v12 = vld [vmem:[%s2889_s27 + $0x38] sm:$0xff] }
  0x25   : > { %2511 = vmatmul.mubr.msk.f32.gmra.mrb[2].mxu0 %vm334_vm0, %v324_v7 }
  0x26   : > { %2513 = vmatprep.mubr.msk.f32.mxu0 %vm334_vm0, %v325_v8  ;;  %2523 = vmatmul.mubr.msk.f32.gmra.mrb[2].mxu1 %vm334_vm0, %v332_v9 }
  0x29   : > { %2514 = vmatmul.mubr.msk.f32.gmra.mrb[4].mxu0 %vm334_vm0, %v326_v10 }
  0x2a   : > { %2516 = vmatprep.mubr.msk.f32.mxu0 %vm334_vm0, %v327_v11 }
  0x2d   : > { %2517 = vmatmul.mubr.msk.f32.gmra.mrb[6].mxu0 %vm334_vm0, %v328_v12 }
  0xf4   : > { %v2509_v20 = vpop.f32.mrb[0].mxu0 }
  0xf5   : > { %v437_v21 = vpop.f32.mrb[1].mxu0  ;;  %v2521_v23 = vpop.f32.mrb[0].mxu1 }
  0xf6   : > { %v477_v25 = vpop.f32.mrb[1].mxu1 }
  0xf8   : > { %v2512_v26 = vpop.f32.mrb[2].mxu0 }
  0xf9   : > { %v514_v27 = vcombine.low %v2509_v20, %v2512_v26  ;;  %v515_v28 = vcombine.high %v2509_v20, %v2512_v26  ;;  %v447_v29 = vpop.f32.mrb[3].mxu0  ;;  %v2524_v33 = vpop.f32.mrb[2].mxu1 }
  0xfa   : > { %v498_v30 = vcombine.low %v437_v21, %v447_v29  ;;  %v499_v31 = vcombine.high %v437_v21, %v447_v29  ;;  %v650_v36 = vcombine.low %v2521_v23, %v2524_v33  ;;  %v651_v37 = vcombine.high %v2521_v23, %v2524_v33  ;;  %v487_v38 = vpop.f32.mrb[3].mxu1 }
  0xfb   : > { %v522_v34 = vrot.slane %v514_v27, %v2926_v24  ;;  %v529_v35 = vrot.slane %v515_v28, %v2926_v24  ;;  %v634_v42 = vcombine.low %v477_v25, %v487_v38  ;;  %v635_v43 = vcombine.high %v477_v25, %v487_v38 }
  0xfc   : > { %v506_v39 = vrot.slane %v498_v30, %v2926_v24  ;;  %v513_v40 = vrot.slane %v499_v31, %v2926_v24  ;;  %v2515_v41 = vpop.f32.mrb[4].mxu0  ;;  %v658_v45 = vrot.slane %v650_v36, %v2926_v24  ;;  %v665_v46 = vrot.slane %v651_v37, %v2926_v24 }
  0xfd   : > { %v457_v44 = vpop.f32.mrb[5].mxu0  ;;  %v642_v51 = vrot.slane %v634_v42, %v2926_v24  ;;  %v649_v52 = vrot.slane %v635_v43, %v2926_v24 }
  0xfe   : > { %v562_v47 = vcombine.low %v506_v39, %v522_v34  ;;  %v563_v48 = vcombine.high %v506_v39, %v522_v34  ;;  %v578_v49 = vcombine.low %v513_v40, %v529_v35  ;;  %v579_v50 = vcombine.high %v513_v40, %v529_v35 }
  0xff   : > { %v666_v58 = vcombine.low %v642_v51, %v658_v45  ;;  %v667_v59 = vcombine.high %v642_v51, %v658_v45  ;;  %v682_v60 = vcombine.low %v649_v52, %v665_v46  ;;  %v683_v61 = vcombine.high %v649_v52, %v665_v46 }
 0x100   : > { %v570_v53 = vrot.slane %v562_v47, %v2928_v32  ;;  %v577_v54 = vrot.slane %v563_v48, %v2928_v32  ;;  %v586_v55 = vrot.slane %v578_v49, %v2928_v32  ;;  %v593_v56 = vrot.slane %v579_v50, %v2928_v32  ;;  %v2518_v57 = vpop.f32.mrb[6].mxu0 }
 0x101   : > { %v467_v62 = vpop.f32.mrb[7].mxu0  ;;  %v546_v63 = vcombine.low %v2515_v41, %v2518_v57  ;;  %v547_v0 = vcombine.high %v2515_v41, %v2518_v57  ;;  %v674_v3 = vrot.slane %v666_v58, %v2928_v32  ;;  %v681_v4 = vrot.slane %v667_v59, %v2928_v32 }
 0x102   : > { %v530_v1 = vcombine.low %v457_v44, %v467_v62  ;;  %v531_v2 = vcombine.high %v457_v44, %v467_v62  ;;  %v690_v5 = vrot.slane %v682_v60, %v2928_v32  ;;  %v697_v6 = vrot.slane %v683_v61, %v2928_v32 }
 0x103   : > { %v554_v7 = vrot.slane %v546_v63, %v2926_v24  ;;  %v561_v8 = vrot.slane %v547_v0, %v2926_v24  ;;  %v838_v11 = vcombine.low %v674_v3, %v681_v4  ;;  %v2450_v12 = vcombine.high %v674_v3, %v681_v4 }
 0x104   : > { %v538_v9 = vrot.slane %v530_v1, %v2926_v24  ;;  %v545_v10 = vrot.slane %v531_v2, %v2926_v24  ;;  %v854_v13 = vcombine.low %v690_v5, %v697_v6  ;;  %v2451_v14 = vcombine.high %v690_v5, %v697_v6 }
 0x105   : > { %v2442_v19 = vcombine.low %v570_v53, %v577_v54  ;;  %v2444_v20 = vcombine.high %v570_v53, %v577_v54  ;;  %v2446_v21 = vcombine.low %v586_v55, %v593_v56  ;;  %v2448_v22 = vcombine.high %v586_v55, %v593_v56 }
 0x106   : > { %v594_v15 = vcombine.low %v538_v9, %v554_v7  ;;  %v595_v16 = vcombine.high %v538_v9, %v554_v7  ;;  %v610_v17 = vcombine.low %v545_v10, %v561_v8  ;;  %v611_v18 = vcombine.high %v545_v10, %v561_v8 }
 0x107   : > { %v710_v28 = vrot.slane %v2442_v19, %v2926_v24  ;;  %v726_v29 = vrot.slane %v2444_v20, %v2926_v24  ;;  %v742_v30 = vrot.slane %v2446_v21, %v2926_v24  ;;  %v758_v31 = vrot.slane %v2448_v22, %v2926_v24 }
 0x108   : > { %v602_v23 = vrot.slane %v594_v15, %v2928_v32  ;;  %v609_v25 = vrot.slane %v595_v16, %v2928_v32  ;;  %v618_v26 = vrot.slane %v610_v17, %v2928_v32  ;;  %v625_v27 = vrot.slane %v611_v18, %v2928_v32 }
 0x109   : > { %v767_v37 = vcombine.high %v710_v28, %v726_v29  ;;  %v799_v38 = vcombine.high %v742_v30, %v758_v31  ;;  %v766_v39 = vcombine.low %v710_v28, %v726_v29  ;;  %v798_v40 = vcombine.low %v742_v30, %v758_v31 }
 0x10a   : > { %v2443_v33 = vcombine.low %v602_v23, %v609_v25  ;;  %v2445_v34 = vcombine.high %v602_v23, %v609_v25  ;;  %v2447_v35 = vcombine.low %v618_v26, %v625_v27  ;;  %v2449_v36 = vcombine.high %v618_v26, %v625_v27 }
 0x10b   : > { %v845_v41 = vrot.slane %v838_v11, %v2926_v24  ;;  %v853_v42 = vrot.slane %v2450_v12, %v2926_v24  ;;  %v861_v43 = vrot.slane %v854_v13, %v2926_v24  ;;  %v869_v44 = vrot.slane %v2451_v14, %v2926_v24 }
 0x10c   : > { %v781_v45 = vrot.slane %v767_v37, %v2928_v32  ;;  %v813_v46 = vrot.slane %v799_v38, %v2928_v32  ;;  %v2965_v47 = vrot.slane %v766_v39, %v2928_v32  ;;  %v2968_v48 = vrot.slane %v798_v40, %v2928_v32 }
 0x10d   : > { %v870_v49 = vcombine.low %v845_v41, %v853_v42  ;;  %v886_v50 = vcombine.low %v861_v43, %v869_v44  ;;  %v717_v51 = vrot.slane %v2443_v33, %v2926_v24  ;;  %v733_v52 = vrot.slane %v2445_v34, %v2926_v24 }
 0x10e   : > { %v833_v53 = vcombine.high %v781_v45, %v813_v46  ;;  %v831_v54 = vcombine.high %v2965_v47, %v2968_v48  ;;  %v830_v55 = vcombine.low %v2965_v47, %v2968_v48  ;;  %v832_v56 = vcombine.low %v781_v45, %v813_v46  ;;  %v496_v48 = vld [vmem:[%s3454_s1] sm:$0xff] }
 0x10f   : > { %v2977_v57 = vrot.slane %v870_v49, %v2928_v32  ;;  %v2980_v58 = vrot.slane %v886_v50, %v2928_v32  ;;  %v749_v59 = vrot.slane %v2447_v35, %v2926_v24  ;;  %v765_v60 = vrot.slane %v2449_v36, %v2926_v24 }
 0x110   : > { %915 = vrot.lane.b32.xlu1 %v833_v53, %s2788_s23  ;;  %907 = vrot.lane.b32.xlu0 %v831_v54, %s2789_s6  ;;  %v782_v61 = vcombine.low %v717_v51, %v733_v52  ;;  %v871_v62 = vcombine.high %v845_v41, %v853_v42  ;;  %v887_v63 = vcombine.high %v861_v43, %v869_v44  ;;  %v2792_v17 = vmov 0.0  }
 0x111   : > { %v903_v0 = vcombine.high %v2977_v57, %v2980_v58  ;;  %v814_v1 = vcombine.low %v749_v59, %v765_v60  ;;  %v783_v2 = vcombine.high %v717_v51, %v733_v52  ;;  %v815_v3 = vcombine.high %v749_v59, %v765_v60  ;;  %1093 = vmatprep.mubr.f32.mxu1 %v2792_v17  ;;  %v497_v52 = vld [vmem:[%s3454_s1 + $0x8] sm:$0xff] }
 0x112   : > { %v790_v4 = vrot.slane %v782_v61, %v2928_v32  ;;  %v885_v5 = vrot.slane %v871_v62, %v2928_v32  ;;  %v901_v6 = vrot.slane %v887_v63, %v2928_v32  ;;  %v902_v10 = vcombine.low %v2977_v57, %v2980_v58 }
 0x113   : > { %v822_v7 = vrot.slane %v814_v1, %v2928_v32  ;;  %v797_v8 = vrot.slane %v783_v2, %v2928_v32  ;;  %v829_v9 = vrot.slane %v815_v3, %v2928_v32  ;;  %v963_v18 = vcombine.low %v2792_v17, %v2792_v17 }
 0x114   : > { %911 = vrot.lane.b32.xlu0 %v832_v56, %s2790_s10  ;;  %v904_v11 = vcombine.low %v885_v5, %v901_v6  ;;  %v905_v12 = vcombine.high %v885_v5, %v901_v6 }
 0x115   : > { %v834_v13 = vcombine.low %v790_v4, %v822_v7  ;;  %v835_v14 = vcombine.high %v790_v4, %v822_v7  ;;  %v836_v15 = vcombine.low %v797_v8, %v829_v9  ;;  %v837_v16 = vcombine.high %v797_v8, %v829_v9 }
 0x116   : > { %v970_v19 = vrot.slane %v963_v18, %v2926_v24 }
 0x117   : > { %919 = vrot.lane.b32.xlu1 %v834_v13, %s2791_s11 }
 0x118   : > { %935 = vrot.lane.b32.xlu0 %v903_v0, %s2789_s6  ;;  %v971_v20 = vcombine.low %v970_v19, %v970_v19  ;;  %v972_v21 = vcombine.high %v970_v19, %v970_v19 }
 0x11a   : > { %v979_v22 = vrot.slane %v971_v20, %v2928_v32  ;;  %v986_v23 = vrot.slane %v972_v21, %v2928_v32 }
 0x11b   : > { %923 = vrot.lane.b32.xlu1 %v835_v14, %s2793_s12 }
 0x11c   : > { %939 = vrot.lane.b32.xlu0 %v904_v11, %s2790_s10  ;;  %v988_v25 = vcombine.high %v979_v22, %v979_v22  ;;  %v989_v26 = vcombine.low %v986_v23, %v986_v23  ;;  %v990_v27 = vcombine.high %v986_v23, %v986_v23  ;;  %v987_v49 = vcombine.low %v979_v22, %v979_v22 }
 0x11f   : > { %927 = vrot.lane.b32.xlu1 %v836_v15, %s2794_s13 }
 0x120   : > { %943 = vrot.lane.b32.xlu0 %v905_v12, %s2788_s23 }
 0x123   : > { %931 = vrot.lane.b32.xlu1 %v837_v16, %s2795_s14 }
 0x124   : > { %992 = vrot.lane.b32.xlu0 %v988_v25, %s2789_s6 }
 0x127   : > { %996 = vrot.lane.b32.xlu1 %v989_v26, %s2790_s10 }
 0x128   : > { %1000 = vrot.lane.b32.xlu0 %v990_v27, %s2788_s23 }
 0x12b   : > { %1004 = vrot.lane.b32.xlu1 %v2792_v17, %s2791_s11 }
 0x12c   : > { %1007 = vrot.lane.b32.xlu0 %v2792_v17, %s2793_s12 }
 0x12f   : > { %1010 = vrot.lane.b32.xlu1 %v2792_v17, %s2794_s13 }
 0x130   : > { %1013 = vrot.lane.b32.xlu0 %v2792_v17, %s2795_s14 }
 0x182   : > { %v908_v28 = vpop.permute.xlu0 %907  ;;  %v916_v29 = vpop.permute.xlu1 %915 }
 0x183   : > { %v947_v35 = vsel %vm946_vm1, %v830_v55, %v908_v28 }
 0x186   : > { %v912_v30 = vpop.permute.xlu0 %911 }
 0x187   : > { %v949_v37 = vsel %vm948_vm2, %v947_v35, %v912_v30 }
 0x188   : > { %v951_v40 = vsel %vm950_vm3, %v949_v37, %v916_v29 }
 0x189   : > { %v920_v31 = vpop.permute.xlu1 %919 }
 0x18a   : > { %v936_v33 = vpop.permute.xlu0 %935  ;;  %v953_v43 = vsel %vm952_vm4, %v951_v40, %v920_v31 }
 0x18b   : > { %v960_v38 = vsel %vm946_vm1, %v902_v10, %v936_v33 }
 0x18d   : > { %v924_v34 = vpop.permute.xlu1 %923 }
 0x18e   : > { %v940_v36 = vpop.permute.xlu0 %939  ;;  %v955_v45 = vsel %vm954_vm5, %v953_v43, %v924_v34 }
 0x18f   : > { %v961_v41 = vsel %vm948_vm2, %v960_v38, %v940_v36 }
 0x191   : > { %v928_v39 = vpop.permute.xlu1 %927 }
 0x192   : > { %v944_v42 = vpop.permute.xlu0 %943  ;;  %v957_v46 = vsel %vm956_vm6, %v955_v45, %v928_v39 }
 0x193   : > { %v962_v44 = vsel %vm950_vm3, %v961_v41, %v944_v42 }
 0x194   : > { %1029 = vmatprep.subr.mxu1 %v962_v44 }
 0x195   : > { %v932_v47 = vpop.permute.xlu1 %931 }
 0x196   : > { %v959_v50 = vsel %vm958_vm7, %v957_v46, %v932_v47  ;;  %v993_v51 = vpop.permute.xlu0 %992 }
 0x197   : > { %1030 = vmatpush1.msra.mxu1 %v959_v50  ;;  %v1016_v53 = vsel %vm946_vm1, %v987_v49, %v993_v51 }
 0x198   : > { %2452 = vmatmul.mubr.msk.f32.vlgmr.msra.gmra.mrb[4].mxu1 %vm334_vm0, %v496_v48 }
 0x199   : > { %1099 = vmatprep.mubr.f32.mxu1 %v2792_v17  ;;  %v997_v54 = vpop.permute.xlu1 %996 }
 0x19a   : > { %v1017_v55 = vsel %vm948_vm2, %v1016_v53, %v997_v54  ;;  %v1001_v56 = vpop.permute.xlu0 %1000 }
 0x19b   : > { %v1018_v57 = vsel %vm950_vm3, %v1017_v55, %v1001_v56 }
 0x19c   : > { %2453 = vmatmul.mubr.msk.f32.gmra.mrb[6].mxu1 %vm334_vm0, %v497_v52 }
 0x19d   : > { %v1005_v58 = vpop.permute.xlu1 %1004 }
 0x19e   : > { %v1019_v59 = vsel %vm952_vm4, %v1018_v57, %v1005_v58  ;;  %v1008_v60 = vpop.permute.xlu0 %1007 }
 0x19f   : > { %v1020_v61 = vsel %vm954_vm5, %v1019_v59, %v1008_v60 }
 0x1a1   : > { %v1011_v62 = vpop.permute.xlu1 %1010 }
 0x1a2   : > { %v1021_v63 = vsel %vm956_vm6, %v1020_v61, %v1011_v62  ;;  %v1014_v0 = vpop.permute.xlu0 %1013 }
 0x1a3   : > { %v1022_v1 = vsel %vm958_vm7, %v1021_v63, %v1014_v0 }
 0x26b   : > { %v1095_v2 = vpop.f32.mrb[4].mxu1 }
 0x26c   : > { %v1096_v3 = vadd.f32 %v1095_v2, %v1022_v1  ;;  %v1097_v4 = vpop.f32.mrb[5].mxu1 }
 0x26d   : > { %v3042_v5 = vadd.f32 %v1097_v4, %v1018_v57 }
 0x26e   : > { %1108 = vrot.lane.b32.xlu1 %v1096_v3, %s2795_s14 }
 0x26f   : > { %v1101_v6 = vpop.f32.mrb[6].mxu1 }
 0x270   : > { %v1102_v7 = vadd.f32 %v1101_v6, %v1022_v1  ;;  %v1103_v8 = vpop.f32.mrb[7].mxu1 }
 0x271   : > { %v3045_v9 = vadd.f32 %v1103_v8, %v1018_v57 }
 0x272   : > { %1110 = vrot.lane.b32.xlu0 %v1102_v7, %s2795_s14  ;;  %1114 = vrot.lane.b32.xlu1 %v1096_v3, %s2794_s13 }
 0x276   : > { %1116 = vrot.lane.b32.xlu0 %v1102_v7, %s2794_s13  ;;  %1120 = vrot.lane.b32.xlu1 %v1096_v3, %s2793_s12 }
 0x27a   : > { %1122 = vrot.lane.b32.xlu0 %v1102_v7, %s2793_s12  ;;  %1126 = vrot.lane.b32.xlu1 %v1096_v3, %s2791_s11 }
 0x27e   : > { %1128 = vrot.lane.b32.xlu0 %v1102_v7, %s2791_s11  ;;  %1132 = vrot.lane.b32.xlu1 %v1096_v3, %s2788_s23 }
 0x282   : > { %1134 = vrot.lane.b32.xlu0 %v1102_v7, %s2788_s23  ;;  %1138 = vrot.lane.b32.xlu1 %v1096_v3, %s2790_s10 }
 0x286   : > { %1140 = vrot.lane.b32.xlu0 %v1102_v7, %s2790_s10  ;;  %1144 = vrot.lane.b32.xlu1 %v1096_v3, %s2789_s6 }
 0x28a   : > { %1146 = vrot.lane.b32.xlu0 %v1102_v7, %s2789_s6  ;;  %1152 = vrot.lane.b32.xlu1 %v3042_v5, %s2795_s14 }
 0x28e   : > { %1154 = vrot.lane.b32.xlu0 %v3045_v9, %s2795_s14  ;;  %1158 = vrot.lane.b32.xlu1 %v3042_v5, %s2794_s13 }
 0x292   : > { %1160 = vrot.lane.b32.xlu0 %v3045_v9, %s2794_s13  ;;  %1164 = vrot.lane.b32.xlu1 %v3042_v5, %s2793_s12 }
 0x296   : > { %1166 = vrot.lane.b32.xlu0 %v3045_v9, %s2793_s12 }
 0x2e0   : > { %v1109_v10 = vpop.permute.xlu1 %1108 }
 0x2e4   : > { %v1111_v11 = vpop.permute.xlu0 %1110  ;;  %v1115_v12 = vpop.permute.xlu1 %1114 }
 0x2e5   : > { %v1170_v13 = vcombine.low %v1096_v3, %v1115_v12  ;;  %v1171_v14 = vcombine.high %v1096_v3, %v1115_v12 }
 0x2e7   : > { %v1178_v19 = vrot.slane %v1170_v13, %v2926_v24  ;;  %v1185_v20 = vrot.slane %v1171_v14, %v2926_v24 }
 0x2e8   : > { %v1117_v15 = vpop.permute.xlu0 %1116  ;;  %v1121_v16 = vpop.permute.xlu1 %1120 }
 0x2e9   : > { %v1186_v17 = vcombine.low %v1109_v10, %v1121_v16  ;;  %v1187_v18 = vcombine.high %v1109_v10, %v1121_v16  ;;  %v1374_v23 = vcombine.low %v1102_v7, %v1117_v15  ;;  %v1375_v25 = vcombine.high %v1102_v7, %v1117_v15 }
 0x2eb   : > { %v1194_v21 = vrot.slane %v1186_v17, %v2926_v24  ;;  %v1201_v22 = vrot.slane %v1187_v18, %v2926_v24  ;;  %v1382_v39 = vrot.slane %v1374_v23, %v2926_v24  ;;  %v1389_v40 = vrot.slane %v1375_v25, %v2926_v24 }
 0x2ec   : > { %v1123_v26 = vpop.permute.xlu0 %1122  ;;  %v3076_v27 = vpop.permute.xlu1 %1126 }
 0x2ed   : > { %v1234_v28 = vcombine.low %v1178_v19, %v1194_v21  ;;  %v1235_v29 = vcombine.high %v1178_v19, %v1194_v21  ;;  %v1250_v30 = vcombine.low %v1185_v20, %v1201_v22  ;;  %v1251_v31 = vcombine.high %v1185_v20, %v1201_v22 }
 0x2ee   : > { %v1390_v33 = vcombine.low %v1111_v11, %v1123_v26  ;;  %v1391_v34 = vcombine.high %v1111_v11, %v1123_v26 }
 0x2ef   : > { %v1242_v35 = vrot.slane %v1234_v28, %v2928_v32  ;;  %v1249_v36 = vrot.slane %v1235_v29, %v2928_v32  ;;  %v1258_v37 = vrot.slane %v1250_v30, %v2928_v32  ;;  %v1265_v38 = vrot.slane %v1251_v31, %v2928_v32 }
 0x2f0   : > { %v1398_v41 = vrot.slane %v1390_v33, %v2926_v24  ;;  %v1405_v42 = vrot.slane %v1391_v34, %v2926_v24  ;;  %v3086_v43 = vpop.permute.xlu0 %1128  ;;  %v3088_v44 = vpop.permute.xlu1 %1132 }
 0x2f1   : > { %v2454_v45 = vcombine.low %v1242_v35, %v1249_v36  ;;  %v2456_v46 = vcombine.high %v1242_v35, %v1249_v36  ;;  %v2458_v47 = vcombine.low %v1258_v37, %v1265_v38  ;;  %v2460_v48 = vcombine.high %v1258_v37, %v1265_v38 }
 0x2f2   : > { %v1438_v49 = vcombine.low %v1382_v39, %v1398_v41  ;;  %v1439_v50 = vcombine.high %v1382_v39, %v1398_v41  ;;  %v1454_v51 = vcombine.low %v1389_v40, %v1405_v42  ;;  %v1455_v52 = vcombine.high %v1389_v40, %v1405_v42 }
 0x2f3   : > { %v1586_v53 = vrot.slane %v2454_v45, %v2926_v24  ;;  %v1602_v54 = vrot.slane %v2456_v46, %v2926_v24  ;;  %v1618_v55 = vrot.slane %v2458_v47, %v2926_v24  ;;  %v1634_v56 = vrot.slane %v2460_v48, %v2926_v24 }
 0x2f4   : > { %v1446_v57 = vrot.slane %v1438_v49, %v2928_v32  ;;  %v1453_v58 = vrot.slane %v1439_v50, %v2928_v32  ;;  %v1462_v59 = vrot.slane %v1454_v51, %v2928_v32  ;;  %v1469_v60 = vrot.slane %v1455_v52, %v2928_v32  ;;  %v1135_v61 = vpop.permute.xlu0 %1134  ;;  %v1139_v62 = vpop.permute.xlu1 %1138 }
 0x2f5   : > { %v1642_v63 = vcombine.low %v1586_v53, %v1602_v54  ;;  %v1643_v0 = vcombine.high %v1586_v53, %v1602_v54  ;;  %v1674_v1 = vcombine.low %v1618_v55, %v1634_v56  ;;  %v1675_v2 = vcombine.high %v1618_v55, %v1634_v56 }
 0x2f6   : > { %v2462_v3 = vcombine.low %v1446_v57, %v1453_v58  ;;  %v2464_v4 = vcombine.high %v1446_v57, %v1453_v58  ;;  %v2466_v6 = vcombine.low %v1462_v59, %v1469_v60  ;;  %v2468_v7 = vcombine.high %v1462_v59, %v1469_v60 }
 0x2f7   : > { %v1650_v8 = vrot.slane %v1642_v63, %v2928_v32  ;;  %v1657_v10 = vrot.slane %v1643_v0, %v2928_v32  ;;  %v1682_v11 = vrot.slane %v1674_v1, %v2928_v32  ;;  %v1689_v12 = vrot.slane %v1675_v2, %v2928_v32 }
 0x2f8   : > { %v1722_v13 = vrot.slane %v2462_v3, %v2926_v24  ;;  %v1738_v14 = vrot.slane %v2464_v4, %v2926_v24  ;;  %v1754_v15 = vrot.slane %v2466_v6, %v2926_v24  ;;  %v1770_v16 = vrot.slane %v2468_v7, %v2926_v24  ;;  %v1141_v17 = vpop.permute.xlu0 %1140  ;;  %v1145_v18 = vpop.permute.xlu1 %1144 }
 0x2f9   : > { %v1706_v19 = vcombine.low %v1650_v8, %v1682_v11  ;;  %v1707_v20 = vcombine.high %v1650_v8, %v1682_v11  ;;  %v1708_v21 = vcombine.low %v1657_v10, %v1689_v12  ;;  %v1709_v22 = vcombine.high %v1657_v10, %v1689_v12 }
 0x2fa   : > { %v1778_v23 = vcombine.low %v1722_v13, %v1738_v14  ;;  %v1779_v25 = vcombine.high %v1722_v13, %v1738_v14  ;;  %v1810_v26 = vcombine.low %v1754_v15, %v1770_v16  ;;  %v1811_v28 = vcombine.high %v1754_v15, %v1770_v16 }
 0x2fb   : > { %1986 = vst.msk [vmem:[%s2896_s20] sm:$0xff] %vm946_vm1, %v1706_v19  ;;  %1988 = vst.msk [vmem:[%s2896_s20 + $0x10] sm:$0xff] %vm946_vm1, %v1707_v20  ;;  %v1202_v29 = vcombine.low %v3076_v27, %v1139_v62  ;;  %v1203_v30 = vcombine.high %v3076_v27, %v1139_v62  ;;  %v1406_v38 = vcombine.low %v3086_v43, %v1141_v17 }
 0x2fc   : > { %1990 = vst.msk [vmem:[%s2896_s20 + $0x20] sm:$0xff] %vm946_vm1, %v1708_v21  ;;  %1992 = vst.msk [vmem:[%s2896_s20 + $0x30] sm:$0xff] %vm946_vm1, %v1709_v22  ;;  %v1786_v31 = vrot.slane %v1778_v23, %v2928_v32  ;;  %v1793_v33 = vrot.slane %v1779_v25, %v2928_v32  ;;  %v1818_v34 = vrot.slane %v1810_v26, %v2928_v32  ;;  %v1147_v36 = vpop.permute.xlu0 %1146  ;;  %v3120_v37 = vpop.permute.xlu1 %1152 }
 0x2fd   : > { %v1825_v35 = vrot.slane %v1811_v28, %v2928_v32  ;;  %v1407_v39 = vcombine.high %v3086_v43, %v1141_v17  ;;  %v1218_v45 = vcombine.low %v3088_v44, %v1145_v18  ;;  %v1219_v46 = vcombine.high %v3088_v44, %v1145_v18 }
 0x2fe   : > { %v1842_v27 = vcombine.low %v1786_v31, %v1818_v34  ;;  %v1843_v40 = vcombine.high %v1786_v31, %v1818_v34  ;;  %v1422_v47 = vcombine.low %v1135_v61, %v1147_v36  ;;  %v1423_v48 = vcombine.high %v1135_v61, %v1147_v36 }
 0x2ff   : > { %v1844_v41 = vcombine.low %v1793_v33, %v1825_v35  ;;  %v1845_v42 = vcombine.high %v1793_v33, %v1825_v35  ;;  %v1210_v43 = vrot.slane %v1202_v29, %v2926_v24  ;;  %v1217_v49 = vrot.slane %v1203_v30, %v2926_v24 }
 0x300   : > { %1987 = vst.msk [vmem:[%s2896_s20 + $0x8] sm:$0xff] %vm946_vm1, %v1842_v27  ;;  %1989 = vst.msk [vmem:[%s2896_s20 + $0x18] sm:$0xff] %vm946_vm1, %v1843_v40  ;;  %v3136_v50 = vpop.permute.xlu1 %1158  ;;  %v1226_v51 = vrot.slane %v1218_v45, %v2926_v24  ;;  %v1233_v44 = vrot.slane %v1219_v46, %v2926_v24  ;;  %v1430_v52 = vrot.slane %v1422_v47, %v2926_v24  ;;  %v3148_v62 = vpop.permute.xlu0 %1154 }
 0x301   : > { %1991 = vst.msk [vmem:[%s2896_s20 + $0x28] sm:$0xff] %vm946_vm1, %v1844_v41  ;;  %1993 = vst.msk [vmem:[%s2896_s20 + $0x38] sm:$0xff] %vm946_vm1, %v1845_v42  ;;  %v1437_v53 = vrot.slane %v1423_v48, %v2926_v24  ;;  %v1414_v54 = vrot.slane %v1406_v38, %v2926_v24  ;;  %v1421_v55 = vrot.slane %v1407_v39, %v2926_v24 }
 0x302   : > { %v1306_v56 = vcombine.low %v3042_v5, %v3136_v50  ;;  %v1307_v57 = vcombine.high %v3042_v5, %v3136_v50  ;;  %v1266_v58 = vcombine.low %v1210_v43, %v1226_v51  ;;  %v1267_v59 = vcombine.high %v1210_v43, %v1226_v51 }
 0x303   : > { %v1282_v60 = vcombine.low %v1217_v49, %v1233_v44  ;;  %v1283_v61 = vcombine.high %v1217_v49, %v1233_v44  ;;  %v1470_v63 = vcombine.low %v1414_v54, %v1430_v52  ;;  %v1471_v0 = vcombine.high %v1414_v54, %v1430_v52 }
 0x304   : > { %v1486_v1 = vcombine.low %v1421_v55, %v1437_v53  ;;  %v1487_v2 = vcombine.high %v1421_v55, %v1437_v53  ;;  %v1274_v3 = vrot.slane %v1266_v58, %v2928_v32  ;;  %v1281_v4 = vrot.slane %v1267_v59, %v2928_v32  ;;  %v1161_v26 = vpop.permute.xlu0 %1160  ;;  %v1165_v54 = vpop.permute.xlu1 %1164 }
 0x305   : > { %v1290_v6 = vrot.slane %v1282_v60, %v2928_v32  ;;  %v1297_v7 = vrot.slane %v1283_v61, %v2928_v32  ;;  %v1478_v8 = vrot.slane %v1470_v63, %v2928_v32  ;;  %v1485_v10 = vrot.slane %v1471_v0, %v2928_v32 }
 0x306   : > { %v1494_v11 = vrot.slane %v1486_v1, %v2928_v32  ;;  %v1501_v12 = vrot.slane %v1487_v2, %v2928_v32  ;;  %v2455_v13 = vcombine.low %v1274_v3, %v1281_v4  ;;  %v2457_v14 = vcombine.high %v1274_v3, %v1281_v4 }
 0x307   : > { %v2459_v15 = vcombine.low %v1290_v6, %v1297_v7  ;;  %v2461_v16 = vcombine.high %v1290_v6, %v1297_v7  ;;  %v2463_v17 = vcombine.low %v1478_v8, %v1485_v10  ;;  %v2465_v18 = vcombine.high %v1478_v8, %v1485_v10 }
 0x308   : > { %v2467_v19 = vcombine.low %v1494_v11, %v1501_v12  ;;  %v2469_v20 = vcombine.high %v1494_v11, %v1501_v12  ;;  %v1593_v21 = vrot.slane %v2455_v13, %v2926_v24  ;;  %v1609_v22 = vrot.slane %v2457_v14, %v2926_v24  ;;  %v1167_v55 = vpop.permute.xlu0 %1166 }
 0x309   : > { %v1625_v23 = vrot.slane %v2459_v15, %v2926_v24  ;;  %v1641_v25 = vrot.slane %v2461_v16, %v2926_v24  ;;  %v1729_v28 = vrot.slane %v2463_v17, %v2926_v24  ;;  %v1745_v29 = vrot.slane %v2465_v18, %v2926_v24 }
 0x30a   : > { %v1761_v30 = vrot.slane %v2467_v19, %v2926_v24  ;;  %v1777_v31 = vrot.slane %v2469_v20, %v2926_v24  ;;  %v1658_v33 = vcombine.low %v1593_v21, %v1609_v22  ;;  %v1659_v34 = vcombine.high %v1593_v21, %v1609_v22 }
 0x30b   : > { %v1690_v35 = vcombine.low %v1625_v23, %v1641_v25  ;;  %v1691_v36 = vcombine.high %v1625_v23, %v1641_v25  ;;  %v1794_v38 = vcombine.low %v1729_v28, %v1745_v29  ;;  %v1795_v39 = vcombine.high %v1729_v28, %v1745_v29 }
 0x30c   : > { %v1826_v27 = vcombine.low %v1761_v30, %v1777_v31  ;;  %v1827_v40 = vcombine.high %v1761_v30, %v1777_v31  ;;  %v1666_v41 = vrot.slane %v1658_v33, %v2928_v32  ;;  %v1673_v42 = vrot.slane %v1659_v34, %v2928_v32 }
 0x30d   : > { %v1698_v45 = vrot.slane %v1690_v35, %v2928_v32  ;;  %v1705_v46 = vrot.slane %v1691_v36, %v2928_v32  ;;  %v1802_v47 = vrot.slane %v1794_v38, %v2928_v32  ;;  %v1809_v48 = vrot.slane %v1795_v39, %v2928_v32 }
 0x30e   : > { %v1834_v43 = vrot.slane %v1826_v27, %v2928_v32  ;;  %v1841_v49 = vrot.slane %v1827_v40, %v2928_v32  ;;  %v1510_v63 = vcombine.low %v3045_v9, %v1161_v26  ;;  %v1511_v0 = vcombine.high %v3045_v9, %v1161_v26 }
 0x30f   : > { %v1710_v51 = vcombine.low %v1666_v41, %v1698_v45  ;;  %v1711_v44 = vcombine.high %v1666_v41, %v1698_v45  ;;  %v1712_v52 = vcombine.low %v1673_v42, %v1705_v46  ;;  %v1713_v53 = vcombine.high %v1673_v42, %v1705_v46 }
 0x310   : > { %v1846_v58 = vcombine.low %v1802_v47, %v1834_v43  ;;  %v1847_v59 = vcombine.high %v1802_v47, %v1834_v43  ;;  %v1848_v60 = vcombine.low %v1809_v48, %v1841_v49  ;;  %v1849_v61 = vcombine.high %v1809_v48, %v1841_v49 }
 0x311   : > { %1994 = vst.msk [vmem:[%s2896_s20 + $0x40] sm:$0xff] %vm946_vm1, %v1710_v51  ;;  %1996 = vst.msk [vmem:[%s2896_s20 + $0x50] sm:$0xff] %vm946_vm1, %v1711_v44  ;;  %v1322_v1 = vcombine.low %v3120_v37, %v1165_v54  ;;  %v1323_v2 = vcombine.high %v3120_v37, %v1165_v54  ;;  %v1526_v3 = vcombine.low %v3148_v62, %v1167_v55 }
 0x312   : > { %1998 = vst.msk [vmem:[%s2896_s20 + $0x60] sm:$0xff] %vm946_vm1, %v1712_v52  ;;  %2000 = vst.msk [vmem:[%s2896_s20 + $0x70] sm:$0xff] %vm946_vm1, %v1713_v53  ;;  %v1527_v4 = vcombine.high %v3148_v62, %v1167_v55  ;;  %v1314_v9 = vrot.slane %v1306_v56, %v2926_v24  ;;  %v1321_v6 = vrot.slane %v1307_v57, %v2926_v24 }
 0x313   : > { %1995 = vst.msk [vmem:[%s2896_s20 + $0x48] sm:$0xff] %vm946_vm1, %v1846_v58  ;;  %1997 = vst.msk [vmem:[%s2896_s20 + $0x58] sm:$0xff] %vm946_vm1, %v1847_v59  ;;  %v1330_v7 = vrot.slane %v1322_v1, %v2926_v24  ;;  %v1337_v8 = vrot.slane %v1323_v2, %v2926_v24  ;;  %v1534_v37 = vrot.slane %v1526_v3, %v2926_v24 }
 0x314   : > { %1999 = vst.msk [vmem:[%s2896_s20 + $0x68] sm:$0xff] %vm946_vm1, %v1848_v60  ;;  %2001 = vst.msk [vmem:[%s2896_s20 + $0x78] sm:$0xff] %vm946_vm1, %v1849_v61  ;;  %v1541_v10 = vrot.slane %v1527_v4, %v2926_v24  ;;  %v1518_v62 = vrot.slane %v1510_v63, %v2926_v24  ;;  %v1525_v11 = vrot.slane %v1511_v0, %v2926_v24 }
 0x315   : > { %v1338_v12 = vcombine.low %v1314_v9, %v1330_v7  ;;  %v1339_v13 = vcombine.high %v1314_v9, %v1330_v7  ;;  %v1354_v56 = vcombine.low %v1321_v6, %v1337_v8  ;;  %v1355_v14 = vcombine.high %v1321_v6, %v1337_v8 }
 0x316   : > { %v1542_v15 = vcombine.low %v1518_v62, %v1534_v37  ;;  %v1543_v16 = vcombine.high %v1518_v62, %v1534_v37  ;;  %v1558_v5 = vcombine.low %v1525_v11, %v1541_v10  ;;  %v1559_v50 = vcombine.high %v1525_v11, %v1541_v10 }
 0x317   : > { %v1346_v57 = vrot.slane %v1338_v12, %v2928_v32  ;;  %v1353_v17 = vrot.slane %v1339_v13, %v2928_v32  ;;  %v1362_v18 = vrot.slane %v1354_v56, %v2928_v32  ;;  %v1369_v19 = vrot.slane %v1355_v14, %v2928_v32 }
 0x318   : > { %v1550_v20 = vrot.slane %v1542_v15, %v2928_v32  ;;  %v1557_v21 = vrot.slane %v1543_v16, %v2928_v32  ;;  %v1566_v22 = vrot.slane %v1558_v5, %v2928_v32  ;;  %v1573_v23 = vrot.slane %v1559_v50, %v2928_v32 }
 0x319   : > { %v1850_v25 = vcombine.low %v1346_v57, %v1353_v17  ;;  %v2470_v26 = vcombine.high %v1346_v57, %v1353_v17  ;;  %v1866_v28 = vcombine.low %v1362_v18, %v1369_v19  ;;  %v2471_v29 = vcombine.high %v1362_v18, %v1369_v19 }
 0x31a   : > { %v1918_v30 = vcombine.low %v1550_v20, %v1557_v21  ;;  %v2472_v31 = vcombine.high %v1550_v20, %v1557_v21  ;;  %v1934_v33 = vcombine.low %v1566_v22, %v1573_v23  ;;  %v2473_v34 = vcombine.high %v1566_v22, %v1573_v23 }
 0x31b   : > { %v1857_v35 = vrot.slane %v1850_v25, %v2926_v24  ;;  %v1865_v36 = vrot.slane %v2470_v26, %v2926_v24  ;;  %v1873_v38 = vrot.slane %v1866_v28, %v2926_v24  ;;  %v1881_v39 = vrot.slane %v2471_v29, %v2926_v24 }
 0x31c   : > { %v1925_v27 = vrot.slane %v1918_v30, %v2926_v24  ;;  %v1933_v40 = vrot.slane %v2472_v31, %v2926_v24  ;;  %v1941_v41 = vrot.slane %v1934_v33, %v2926_v24  ;;  %v1949_v42 = vrot.slane %v2473_v34, %v2926_v24 }
 0x31d   : > { %v1882_v45 = vcombine.low %v1857_v35, %v1865_v36  ;;  %v1883_v46 = vcombine.high %v1857_v35, %v1865_v36  ;;  %v1898_v47 = vcombine.low %v1873_v38, %v1881_v39  ;;  %v1899_v48 = vcombine.high %v1873_v38, %v1881_v39 }
 0x31e   : > { %v1950_v43 = vcombine.low %v1925_v27, %v1933_v40  ;;  %v1951_v49 = vcombine.high %v1925_v27, %v1933_v40  ;;  %v1966_v51 = vcombine.low %v1941_v41, %v1949_v42  ;;  %v1967_v44 = vcombine.high %v1941_v41, %v1949_v42 }
 0x31f   : > { %v1890_v52 = vrot.slane %v1882_v45, %v2928_v32  ;;  %v1897_v53 = vrot.slane %v1883_v46, %v2928_v32  ;;  %v1906_v54 = vrot.slane %v1898_v47, %v2928_v32  ;;  %v1913_v55 = vrot.slane %v1899_v48, %v2928_v32 }
 0x320   : > { %v1958_v24 = vrot.slane %v1950_v43, %v2928_v32  ;;  %v1965_v58 = vrot.slane %v1951_v49, %v2928_v32  ;;  %v1974_v59 = vrot.slane %v1966_v51, %v2928_v32  ;;  %v1981_v60 = vrot.slane %v1967_v44, %v2928_v32 }
 0x321   : > { %v1914_v61 = vcombine.low %v1890_v52, %v1906_v54  ;;  %v1915_v63 = vcombine.high %v1890_v52, %v1906_v54  ;;  %v1916_v0 = vcombine.low %v1897_v53, %v1913_v55  ;;  %v1917_v1 = vcombine.high %v1897_v53, %v1913_v55 }
 0x322   : > { %v1982_v2 = vcombine.low %v1958_v24, %v1974_v59  ;;  %v1983_v3 = vcombine.high %v1958_v24, %v1974_v59  ;;  %v1984_v4 = vcombine.low %v1965_v58, %v1981_v60  ;;  %v1985_v9 = vcombine.high %v1965_v58, %v1981_v60 }
 0x323   : > { %2002 = vst.msk [vmem:[%s2896_s20 + $0x80] sm:$0xff] %vm946_vm1, %v1914_v61  ;;  %2004 = vst.msk [vmem:[%s2896_s20 + $0x90] sm:$0xff] %vm946_vm1, %v1915_v63 }
 0x324   : > { %2006 = vst.msk [vmem:[%s2896_s20 + $0xa0] sm:$0xff] %vm946_vm1, %v1916_v0  ;;  %2008 = vst.msk [vmem:[%s2896_s20 + $0xb0] sm:$0xff] %vm946_vm1, %v1917_v1 }
 0x325   : > { %2003 = vst.msk [vmem:[%s2896_s20 + $0x88] sm:$0xff] %vm946_vm1, %v1982_v2  ;;  %2005 = vst.msk [vmem:[%s2896_s20 + $0x98] sm:$0xff] %vm946_vm1, %v1983_v3 }
 0x326   : > { %2007 = vst.msk [vmem:[%s2896_s20 + $0xa8] sm:$0xff] %vm946_vm1, %v1984_v4  ;;  %2009 = vst.msk [vmem:[%s2896_s20 + $0xb8] sm:$0xff] %vm946_vm1, %v1985_v9 }
 0x327 PF: > { %p2474_p1 = scmp.lt.s32.totalorder %s2736_s17, 1 }
 0x328   : > { %v2014_v32 = vld [vmem:[%s2894_s22] sm:$0xff] (!%p2474_p1)  ;;  %vm2038_vm8 = vcmask (!%p2474_p1), 130048   ;;  %v2015_v6 = vld [vmem:[%s2894_s22 + $0x8] sm:$0xff] (!%p2474_p1)  ;;  %v2016_v7 = vld [vmem:[%s2894_s22 + $0x10] sm:$0xff] (!%p2474_p1) }
 0x329   : > { %2013 = sbr.rel (%p2474_p1) target bundleno = 821 (0x335), region = 44  ;;  %2039 = vst.msk [vmem:[%s2896_s20] sm:$0xff] (!%p2474_p1), %vm2038_vm8, %v2014_v32  ;;  %2040 = vst.msk [vmem:[%s2896_s20 + $0x8] sm:$0xff] (!%p2474_p1), %vm2038_vm8, %v2015_v6  ;;  %v2017_v8 = vld [vmem:[%s2894_s22 + $0x18] sm:$0xff] (!%p2474_p1)  ;;  %v2018_v37 = vld [vmem:[%s2894_s22 + $0x20] sm:$0xff] (!%p2474_p1) }
 0x32a   : > { %2041 = vst.msk [vmem:[%s2896_s20 + $0x10] sm:$0xff] (!%p2474_p1), %vm2038_vm8, %v2016_v7  ;;  %v2019_v10 = vld [vmem:[%s2894_s22 + $0x28] sm:$0xff] (!%p2474_p1)  ;;  %2042 = vst.msk [vmem:[%s2896_s20 + $0x18] sm:$0xff] (!%p2474_p1), %vm2038_vm8, %v2017_v8  ;;  %v2020_v62 = vld [vmem:[%s2894_s22 + $0x30] sm:$0xff] (!%p2474_p1) }
 0x32b   : > { %2043 = vst.msk [vmem:[%s2896_s20 + $0x20] sm:$0xff] (!%p2474_p1), %vm2038_vm8, %v2018_v37  ;;  %2044 = vst.msk [vmem:[%s2896_s20 + $0x28] sm:$0xff] (!%p2474_p1), %vm2038_vm8, %v2019_v10  ;;  %v2021_v11 = vld [vmem:[%s2894_s22 + $0x38] sm:$0xff] (!%p2474_p1)  ;;  %v2022_v12 = vld [vmem:[%s2894_s22 + $0x40] sm:$0xff] (!%p2474_p1) }
 0x32c   : > { %2045 = vst.msk [vmem:[%s2896_s20 + $0x30] sm:$0xff] (!%p2474_p1), %vm2038_vm8, %v2020_v62  ;;  %2046 = vst.msk [vmem:[%s2896_s20 + $0x38] sm:$0xff] (!%p2474_p1), %vm2038_vm8, %v2021_v11  ;;  %v2023_v13 = vld [vmem:[%s2894_s22 + $0x48] sm:$0xff] (!%p2474_p1)  ;;  %v2024_v56 = vld [vmem:[%s2894_s22 + $0x50] sm:$0xff] (!%p2474_p1) }
 0x32d   : > { %2047 = vst.msk [vmem:[%s2896_s20 + $0x40] sm:$0xff] (!%p2474_p1), %vm2038_vm8, %v2022_v12  ;;  %v2025_v14 = vld [vmem:[%s2894_s22 + $0x58] sm:$0xff] (!%p2474_p1)  ;;  %2048 = vst.msk [vmem:[%s2896_s20 + $0x48] sm:$0xff] (!%p2474_p1), %vm2038_vm8, %v2023_v13  ;;  %v2026_v15 = vld [vmem:[%s2894_s22 + $0x60] sm:$0xff] (!%p2474_p1) }
 0x32e   : > { %2049 = vst.msk [vmem:[%s2896_s20 + $0x50] sm:$0xff] (!%p2474_p1), %vm2038_vm8, %v2024_v56  ;;  %2050 = vst.msk [vmem:[%s2896_s20 + $0x58] sm:$0xff] (!%p2474_p1), %vm2038_vm8, %v2025_v14  ;;  %v2027_v16 = vld [vmem:[%s2894_s22 + $0x68] sm:$0xff] (!%p2474_p1)  ;;  %v2028_v5 = vld [vmem:[%s2894_s22 + $0x70] sm:$0xff] (!%p2474_p1) }
 0x32f   : > { %2051 = vst.msk [vmem:[%s2896_s20 + $0x60] sm:$0xff] (!%p2474_p1), %vm2038_vm8, %v2026_v15  ;;  %2052 = vst.msk [vmem:[%s2896_s20 + $0x68] sm:$0xff] (!%p2474_p1), %vm2038_vm8, %v2027_v16  ;;  %v2029_v50 = vld [vmem:[%s2894_s22 + $0x78] sm:$0xff] (!%p2474_p1)  ;;  %v2030_v57 = vld [vmem:[%s2894_s22 + $0x80] sm:$0xff] (!%p2474_p1) }
 0x330   : > { %2053 = vst.msk [vmem:[%s2896_s20 + $0x70] sm:$0xff] %vm2038_vm8, %v2028_v5  ;;  %v2031_v17 = vld [vmem:[%s2894_s22 + $0x88] sm:$0xff]  ;;  %2054 = vst.msk [vmem:[%s2896_s20 + $0x78] sm:$0xff] %vm2038_vm8, %v2029_v50  ;;  %v2032_v18 = vld [vmem:[%s2894_s22 + $0x90] sm:$0xff] }
 0x331   : > { %2055 = vst.msk [vmem:[%s2896_s20 + $0x80] sm:$0xff] %vm2038_vm8, %v2030_v57  ;;  %2056 = vst.msk [vmem:[%s2896_s20 + $0x88] sm:$0xff] %vm2038_vm8, %v2031_v17  ;;  %v2033_v19 = vld [vmem:[%s2894_s22 + $0x98] sm:$0xff]  ;;  %v2034_v20 = vld [vmem:[%s2894_s22 + $0xa0] sm:$0xff] }
 0x332   : > { %2057 = vst.msk [vmem:[%s2896_s20 + $0x90] sm:$0xff] %vm2038_vm8, %v2032_v18  ;;  %2058 = vst.msk [vmem:[%s2896_s20 + $0x98] sm:$0xff] %vm2038_vm8, %v2033_v19  ;;  %v2035_v21 = vld [vmem:[%s2894_s22 + $0xa8] sm:$0xff]  ;;  %v2036_v22 = vld [vmem:[%s2894_s22 + $0xb0] sm:$0xff] }
 0x333   : > { %2059 = vst.msk [vmem:[%s2896_s20 + $0xa0] sm:$0xff] %vm2038_vm8, %v2034_v20  ;;  %v2037_v23 = vld [vmem:[%s2894_s22 + $0xb8] sm:$0xff]  ;;  %2060 = vst.msk [vmem:[%s2896_s20 + $0xa8] sm:$0xff] %vm2038_vm8, %v2035_v21 }
 0x334   : > { %2061 = vst.msk [vmem:[%s2896_s20 + $0xb0] sm:$0xff] %vm2038_vm8, %v2036_v22  ;;  %2062 = vst.msk [vmem:[%s2896_s20 + $0xb8] sm:$0xff] %vm2038_vm8, %v2037_v23 }
 0x335 PF: > { %2069 = sbr.rel (!%p2867_p5) target bundleno = 892 (0x37c), region = 48 }
 0x336   : > { %s2070_s28 = smul.u32 (%p2867_p5), 12, %s2736_s17 }
 0x337   : > { %s2491_s29 = smul.u32 (%p2867_p5), 24, %s2736_s17 }
 0x338   : > { %s2071_s5 = ssub.s32 (%p2867_p5), 17, %s2070_s28  ;;  %s2530_s7 = smul.u32 (%p2867_p5), 34, %s2740_s18 }
 0x339   : > { %p2072_p2 = scmp.lt.s32.totalorder (%p2867_p5), %s2071_s5, 12 }
 0x33a   : > { %s2079_s8 = sadd.s32 (%p2867_p5), %s2530_s7, %s2491_s29 }
 0x33b   : > { %s2479_s22 = sshll.u32 (%p2867_p5), %s2079_s8, 3 }
 0x33c   : > { %s3489_s5 = smov (!%p2072_p2, %s2071_s5), 12  ;;  %s3334_s26 = scalar_lea.vmem %s3457_s4, %s2479_s22  }
 0x33d   : > { %s2490_s9 = sshll.u32 %s3489_s5, 8  ;;  %s2480_s10 = sshll.u32 %s3489_s5, 1 }
 0x33e   : > { %p2481_p3 = scmp.eq.s32.totalorder %s2490_s9, 0 }
 0x33f   : > { %2662 = sdivrem.u32 (!%p2481_p3), %s2480_s10, 24 }
 0x340   : > { %2085 = sbr.rel (%p2481_p3) target bundleno = 892 (0x37c), region = 52 }
 0x348   : > { %s3339_s17 = spop.drf %2662 }
 0x349   : > { %p2482_p4 = scmp.le.s32.totalorder %s3339_s17, 0 }
 0x34a   : > { %s3465_s18 = smov (!%p2482_p4), %s3334_s26  ;;  %s3466_s11 = smov (!%p2482_p4), %s2896_s20 }
 0x34b   : > { %2357 = sbr.rel (%p2482_p4) target bundleno = 863 (0x35f), region = 131  ;;  %s3348_s12 = smov (!%p2482_p4), 0  }
 0x34c   : > { %s3350_s13 = smov (!%p2482_p4), 0  }
 0x352 LB: >> { %v2195_v25 = vld [vmem:[%s2760_s11] sm:$0xff]  ;;  %v2197_v26 = vld [vmem:[%s2760_s11 + $0x8] sm:$0xff]  ;;  %v2199_v28 = vld [vmem:[%s2760_s11 + $0x10] sm:$0xff]  ;;  %s2243_s14 = sadd.s32 1, %s2764_s12  ;;  %s2189_s13 = sadd.s32 1, %s2768_s13   ;;  %s2768_s13 = sphi %s3350_s13, %s2189_s13   ;;  %s2764_s12 = sphi %s3348_s12, %s3468_s12   ;;  %s2760_s11 = sphi %s3466_s11, %s2248_s11   ;;  %s2756_s18 = sphi %s3465_s18, %s3467_s18  }
 0x353   : >> { %2196 = vst [vmem:[%s2756_s18] sm:$0xff] %v2195_v25  ;;  %2198 = vst [vmem:[%s2756_s18 + $0x8] sm:$0xff] %v2197_v26  ;;  %v2201_v29 = vld [vmem:[%s2760_s11 + $0x18] sm:$0xff]  ;;  %v2203_v30 = vld [vmem:[%s2760_s11 + $0x20] sm:$0xff]  ;;  %p2244_p5 = scmp.ge.s32.totalorder %s2243_s14, %s3339_s17  ;;  %p2188_p6 = scmp.ge.s32.totalorder %s2189_s13, %s3339_s17 }
 0x354   : >> { %2200 = vst [vmem:[%s2756_s18 + $0x10] sm:$0xff] %v2199_v28  ;;  %v2205_v31 = vld [vmem:[%s2760_s11 + $0x28] sm:$0xff]  ;;  %2202 = vst [vmem:[%s2756_s18 + $0x18] sm:$0xff] %v2201_v29  ;;  %v2207_v33 = vld [vmem:[%s2760_s11 + $0x30] sm:$0xff] }
 0x355   : >> { %2204 = vst [vmem:[%s2756_s18 + $0x20] sm:$0xff] %v2203_v30  ;;  %2206 = vst [vmem:[%s2756_s18 + $0x28] sm:$0xff] %v2205_v31  ;;  %v2209_v34 = vld [vmem:[%s2760_s11 + $0x38] sm:$0xff]  ;;  %v2211_v35 = vld [vmem:[%s2760_s11 + $0x40] sm:$0xff]  ;;  %s3491_s14 = smov (%p2244_p5, %s2243_s14), 0 }
 0x356   : >> { %2208 = vst [vmem:[%s2756_s18 + $0x30] sm:$0xff] %v2207_v33  ;;  %2210 = vst [vmem:[%s2756_s18 + $0x38] sm:$0xff] %v2209_v34  ;;  %v2213_v36 = vld [vmem:[%s2760_s11 + $0x48] sm:$0xff]  ;;  %v2215_v38 = vld [vmem:[%s2760_s11 + $0x50] sm:$0xff]  ;;  %s2246_s24 = smul.u32 192, %s3491_s14  ;;  %s3468_s12 = smov %s3491_s14 }
 0x357   : >> { %2212 = vst [vmem:[%s2756_s18 + $0x40] sm:$0xff] %v2211_v35  ;;  %v2217_v39 = vld [vmem:[%s2760_s11 + $0x58] sm:$0xff]  ;;  %2214 = vst [vmem:[%s2756_s18 + $0x48] sm:$0xff] %v2213_v36  ;;  %v2219_v27 = vld [vmem:[%s2760_s11 + $0x60] sm:$0xff] }
 0x358   : >> { %2216 = vst [vmem:[%s2756_s18 + $0x50] sm:$0xff] %v2215_v38  ;;  %2218 = vst [vmem:[%s2756_s18 + $0x58] sm:$0xff] %v2217_v39  ;;  %v2221_v40 = vld [vmem:[%s2760_s11 + $0x68] sm:$0xff]  ;;  %v2223_v41 = vld [vmem:[%s2760_s11 + $0x70] sm:$0xff]  ;;  %s2249_s25 = scalar_lea.vmem %s3334_s26, %s2246_s24   ;;  %2191 = sbr.rel (!%p2188_p6) target bundleno = 850 (0x352), region = 137 }
 0x359   : >> { %2220 = vst [vmem:[%s2756_s18 + $0x60] sm:$0xff] %v2219_v27  ;;  %2222 = vst [vmem:[%s2756_s18 + $0x68] sm:$0xff] %v2221_v40  ;;  %v2225_v42 = vld [vmem:[%s2760_s11 + $0x78] sm:$0xff]  ;;  %v2227_v45 = vld [vmem:[%s2760_s11 + $0x80] sm:$0xff] }
 0x35a   : >> { %2224 = vst [vmem:[%s2756_s18 + $0x70] sm:$0xff] %v2223_v41  ;;  %v2229_v46 = vld [vmem:[%s2760_s11 + $0x88] sm:$0xff]  ;;  %2226 = vst [vmem:[%s2756_s18 + $0x78] sm:$0xff] %v2225_v42  ;;  %v2231_v47 = vld [vmem:[%s2760_s11 + $0x90] sm:$0xff] }
 0x35b   : >> { %2228 = vst [vmem:[%s2756_s18 + $0x80] sm:$0xff] %v2227_v45  ;;  %2230 = vst [vmem:[%s2756_s18 + $0x88] sm:$0xff] %v2229_v46  ;;  %v2233_v48 = vld [vmem:[%s2760_s11 + $0x98] sm:$0xff]  ;;  %v2235_v43 = vld [vmem:[%s2760_s11 + $0xa0] sm:$0xff] }
 0x35c   : >> { %2232 = vst [vmem:[%s2756_s18 + $0x90] sm:$0xff] %v2231_v47  ;;  %2234 = vst [vmem:[%s2756_s18 + $0x98] sm:$0xff] %v2233_v48  ;;  %v2237_v49 = vld [vmem:[%s2760_s11 + $0xa8] sm:$0xff]  ;;  %v2239_v51 = vld [vmem:[%s2760_s11 + $0xb0] sm:$0xff] }
 0x35d   : >> { %2236 = vst [vmem:[%s2756_s18 + $0xa0] sm:$0xff] %v2235_v43  ;;  %v2241_v44 = vld [vmem:[%s2760_s11 + $0xb8] sm:$0xff]  ;;  %s2248_s11 = scalar_lea.vmem %s2896_s20, %s2246_s24 [#allocation2]   ;;  %2238 = vst [vmem:[%s2756_s18 + $0xa8] sm:$0xff] %v2237_v49 }
 0x35e   : >> { %2240 = vst [vmem:[%s2756_s18 + $0xb0] sm:$0xff] %v2239_v51  ;;  %2242 = vst [vmem:[%s2756_s18 + $0xb8] sm:$0xff] %v2241_v44  ;;  %s3467_s18 = smov %s2249_s25 }
 0x35f PF: > { %2664 = sdivrem.u32 %s2480_s10, 24 }
 0x360   : > { %s2483_s27 = smul.u32 192, %s3339_s17 }
 0x362   : > { %s2254_s15 = scalar_lea.vmem %s2896_s20, %s2483_s27 [#allocation2]   ;;  %s2256_s28 = scalar_lea.vmem %s3334_s26, %s2483_s27  }
 0x368   : > { %s2665_s29 = spop.drf %2664 }
 0x369   : > { %p2485_p7 = scmp.le.s32.totalorder %s2665_s29, 0 }
 0x36a   : > { %s2770_s7 = smov (!%p2485_p7), %s2256_s28   ;;  %s2774_s8 = smov (!%p2485_p7), %s2254_s15  }
 0x36b   : > { %2371 = sbr.rel (%p2485_p7) target bundleno = 892 (0x37c), region = 142  ;;  %s2778_s22 = smov (!%p2485_p7), 0  }
 0x36c   : > { %s2782_s9 = smov (!%p2485_p7), 0  }
 0x372 LB: >> { %v2266_v52 = vld [vmem:[%s2776_s8] sm:$0xff]  ;;  %s2268_s5 = sadd.s32 1, %s2780_s22  ;;  %s2260_s9 = sadd.s32 1, %s2784_s9   ;;  %s2784_s9 = sphi %s2782_s9, %s2260_s9   ;;  %s2780_s22 = sphi %s2778_s22, %s2779_s22   ;;  %s2776_s8 = sphi %s2774_s8, %s2273_s8   ;;  %s2772_s7 = sphi %s2770_s7, %s2274_s7  }
 0x373   : >> { %2267 = vst [vmem:[%s2772_s7] sm:$0xff] %v2266_v52  ;;  %p2269_p8 = scmp.ge.s32.totalorder %s2268_s5, %s2665_s29  ;;  %p2259_p9 = scmp.ge.s32.totalorder %s2260_s9, %s2665_s29 }
 0x375   : >> { %s3493_s5 = smov (%p2269_p8, %s2268_s5), 0  ;;  %2262 = sbr.rel (!%p2259_p9) target bundleno = 882 (0x372), region = 148 }
 0x376   : >> { %s2486_s20 = sshll.u32 %s3493_s5, 3  ;;  %s2779_s22 = smov %s3493_s5  }
 0x377   : >> { %s2273_s8 = scalar_lea.vmem %s2254_s15, %s2486_s20 [#allocation2]   ;;  %s2274_s7 = scalar_lea.vmem %s2256_s28, %s2486_s20  }
 0x37c PF: > { %s14_s21 = sadd.s32 1, %s2752_s21   ;;  %s3469_s18 = sld [smem:[#allocation3_spill]] }
 0x37d   : > { %p11_p10 = scmp.ge.s32.totalorder %s14_s21, 6   ;;  %s3470_s23 = sld [smem:[#allocation4_spill]] }
 0x37e   : > { %s3471_s20 = sld [smem:[#allocation5_spill]]  ;;  %s3472_s15 = smov %s2732_s16 }
 0x37f   : > { %s3473_s16 = smov %s2878_s30  ;;  %s3474_s17 = smov %s2744_s19 }
 0x380   :  { %13 = sbr.rel (!%p11_p10) target bundleno = 4 (0x4), region = 159 }
 0x383   : > { %s3475_s19 = smov %s3470_s23 }

</bundles_post_ra>
